<compile_context>
chip_gen: v6e
topology: v6e:2x2x1
jax: 0.10.0
libtpu: 0.0.40
codegen_flags: <defaults>
</compile_context>

<pallas_src>
import jax
import jax.numpy as jnp
from jax.experimental import pallas as pl
from jax.experimental.pallas import tpu as pltpu


# ---------------------------------------------------------------------------
# Kernels
# ---------------------------------------------------------------------------
def _sigmoid_eup(y):
    # sigmoid(y) == 0.5 * tanh(y/2) + 0.5  -> tanh runs on the EUP slot,
    # avoiding the multi-op VALU divide jax.nn.sigmoid can lower to.
    return 0.5 * jnp.tanh(0.5 * y) + 0.5


def modulate_kernel(x_ref, w1_ref, b1_ref, w2_ref, b2_ref, o_ref):
    # x_ref : (C, TS)   input channel tile (lanes = spatial)
    # w1_ref: (Mid, C)  block-diagonal grouped conv1 weight (resident)
    # b1_ref: (Mid, 1)  f32
    # w2_ref: (C, Mid)  block-diagonal grouped conv2 weight (resident)
    # b2_ref: (C, 1)    f32
    # o_ref : (C, TS)   sigmoid gate
    w1 = w1_ref[...]
    w2 = w2_ref[...]
    h = jnp.dot(w1, x_ref[...].astype(w1.dtype),
                preferred_element_type=jnp.float32)
    h = jnp.maximum(h + b1_ref[...], 0.0)                       # ReLU (f32)
    y = jnp.dot(w2, h.astype(w2.dtype),
                preferred_element_type=jnp.float32) + b2_ref[...]
    o_ref[...] = _sigmoid_eup(y).astype(o_ref.dtype)            # Sigmoid


def modulate_gate_kernel(x_ref, f_ref, w1_ref, b1_ref, w2_ref, b2_ref, o_ref):
    # Same as above but fuses the downstream gating multiply:
    # o = sigmoid(conv2(relu(conv1(x)))) * features
    w1 = w1_ref[...]
    w2 = w2_ref[...]
    h = jnp.dot(w1, x_ref[...].astype(w1.dtype),
                preferred_element_type=jnp.float32)
    h = jnp.maximum(h + b1_ref[...], 0.0)
    y = jnp.dot(w2, h.astype(w2.dtype),
                preferred_element_type=jnp.float32) + b2_ref[...]
    gate = _sigmoid_eup(y)
    o_ref[...] = (gate * f_ref[...].astype(jnp.float32)).astype(o_ref.dtype)


# ---------------------------------------------------------------------------
# Wrapper helpers
# ---------------------------------------------------------------------------
def _cdiv(a, b):
    return -(-a // b)


def _round_up(v, m):
    return _cdiv(v, m) * m


def _pad_tile_bytes(shape2d, itemsize):
    # Conservative VMEM footprint of one buffered 2-D block ((8,128) tiling).
    r, c = shape2d
    return _round_up(max(r, 1), 8) * _round_up(max(c, 1), 128) * itemsize


def _vmem_capacity_bytes():
    try:
        return int(pltpu.get_tpu_info().vmem_capacity_bytes)
    except Exception:
        return 64 * 1024 * 1024       # conservative (v7x per-TC VMEM)


def _choose_tile(S, N, per_lane128_bytes, weight_bytes, target_ts, budget):
    """Largest lane tile (multiple of 128) fitting the VMEM budget, with
    v7x megacore friendliness (>=2 total steps, prefer even spatial count)."""
    s128 = _round_up(S, 128)
    avail = max(budget - weight_bytes, per_lane128_bytes)
    max_ts = max(128, (avail // per_lane128_bytes) * 128)
    ts = max(128, (min(target_ts, max_ts, s128) // 128) * 128)

    # Keep total step count >= 2 so both v7x TensorCores get work.
    while ts > 128 and N * _cdiv(S, ts) < 2:
        ts = max(128, ((ts // 2) // 128) * 128)

    # When N is odd, prefer an even spatial tile count for a balanced 2-TC
    # split (only if it does not shrink the tile by more than half).
    if N % 2 == 1 and _cdiv(S, ts) % 2 == 1:
        t = ts
        while t > 128 and _cdiv(S, t) % 2 == 1:
            t -= 128
        if _cdiv(S, t) % 2 == 0 and t >= max(128, ts // 2):
            ts = t
    return ts


# ---------------------------------------------------------------------------
# Wrapper
# ---------------------------------------------------------------------------
def modulate_forward(x, w1_bd, b1, w2_bd, b2, *, features=None, out_dtype=None,
                     mxu_dtype=jnp.bfloat16, ts=None, target_ts=8192,
                     vmem_budget_bytes=None):
    """x: (N, C, D, H, W) -> sigmoid gate (same shape, dtype `out_dtype`).

    If `features` is given, returns gate * features (fused, saves an HBM pass).
    `mxu_dtype=jnp.float32` gives the exact-precision path; the default bf16
    MXU feed is essentially free precision-wise for a sigmoid gate.
    """
    N, C = x.shape[0], x.shape[1]
    spatial = tuple(x.shape[2:])
    S = 1
    for d in spatial:
        S *= d
    Mid = w1_bd.shape[0]

    if out_dtype is None:
        out_dtype = x.dtype if features is None else features.dtype

    # Weight / bias packing: matmul operands in mxu_dtype, biases in f32
    # (all elementwise math stays f32; cast only at the final store).
    w1_bd = w1_bd.astype(mxu_dtype)
    w2_bd = w2_bd.astype(mxu_dtype)
    b1 = b1.reshape(Mid, 1).astype(jnp.float32)
    b2 = b2.reshape(C, 1).astype(jnp.float32)

    x_it = jnp.dtype(x.dtype).itemsize
    o_it = jnp.dtype(out_dtype).itemsize
    f_it = 0 if features is None else jnp.dtype(features.dtype).itemsize
    w_it = jnp.dtype(mxu_dtype).itemsize

    # Every input spec is double-buffered by the Pallas pipeline, including
    # the constant-index weight/bias specs.
    weight_bytes = 2 * (_pad_tile_bytes((Mid, C), w_it)
                        + _pad_tile_bytes((C, Mid), w_it)
                        + _pad_tile_bytes((Mid, 1), 4)
                        + _pad_tile_bytes((C, 1), 4))
    # Double-buffered big (C, ts) tensors, per 128 lanes of ts.
    per_lane128 = 2 * C * 128 * (x_it + o_it + f_it)

    vmem_cap = _vmem_capacity_bytes()
    if vmem_budget_bytes is None:
        # Generation aware: ~85 MiB on 128 MiB parts (v5e/v6e), ~42 MiB on
        # 64 MiB-per-TC parts (v7x), leaving headroom for compiler scratch.
        vmem_budget_bytes = min(96 * 1024 * 1024, (vmem_cap * 2) // 3)

    if ts is None:
        ts = _choose_tile(S, N, per_lane128, weight_bytes,
                          target_ts, vmem_budget_bytes)

    # vmem_limit tied to the same footprint accounting used to pick ts.
    footprint = per_lane128 * (ts // 128) + weight_bytes
    vmem_limit = int(min(vmem_cap, footprint + 4 * 1024 * 1024))

    grid = (N, _cdiv(S, ts))   # ragged last tile handled by Pallas OOB rules

    def tile_spec():
        return pl.BlockSpec((None, C, ts), lambda n, s: (n, 0, s))

    w_specs = [
        pl.BlockSpec((Mid, C), lambda n, s: (0, 0)),   # resident (constant idx)
        pl.BlockSpec((Mid, 1), lambda n, s: (0, 0)),
        pl.BlockSpec((C, Mid), lambda n, s: (0, 0)),
        pl.BlockSpec((C, 1), lambda n, s: (0, 0)),
    ]

    cparams = pltpu.CompilerParams(
        dimension_semantics=("parallel", "parallel"),
        vmem_limit_bytes=vmem_limit)

    cost = pl.CostEstimate(
        flops=4 * N * S * Mid * C,                     # two block-diag matmuls
        transcendentals=N * C * S,                     # sigmoid (tanh)
        bytes_accessed=N * C * S * (x_it + o_it + f_it)
        + 2 * Mid * C * w_it + (Mid + C) * 4)

    xs = x.reshape(N, C, S)                            # metadata-only

    if features is None:
        out = pl.pallas_call(
            modulate_kernel,
            out_shape=jax.ShapeDtypeStruct((N, C, S), out_dtype),
            grid=grid,
            in_specs=[tile_spec()] + w_specs,
            out_specs=pl.BlockSpec((None, C, ts), lambda n, s: (n, 0, s)),
            compiler_params=cparams,
            cost_estimate=cost,
        )(xs, w1_bd, b1, w2_bd, b2)
    else:
        fs = features.reshape(N, C, S)                 # metadata-only
        out = pl.pallas_call(
            modulate_gate_kernel,
            out_shape=jax.ShapeDtypeStruct((N, C, S), out_dtype),
            grid=grid,
            in_specs=[tile_spec(), tile_spec()] + w_specs,
            out_specs=pl.BlockSpec((None, C, ts), lambda n, s: (n, 0, s)),
            compiler_params=cparams,
            cost_estimate=cost,
        )(xs, fs, w1_bd, b1, w2_bd, b2)

    return out.reshape((N, C) + spatial)               # metadata-only


# ---------------------------------------------------------------------------
# Parameter packing / reference (plain JAX glue)
# ---------------------------------------------------------------------------
def block_diag_from_groups(wg):
    """(G, o, i) per-group weights -> (G*o, G*i) block-diagonal matrix."""
    G, o, i = wg.shape
    eye = jnp.eye(G, dtype=wg.dtype)
    return jnp.einsum('gab,gh->gahb', wg, eye).reshape(G * o, G * i)


def make_params(key, channel, num_groups, compressions):
    """Deterministic kaiming_normal_(mode='fan_out', relu) weights, zero biases."""
    mid = channel // compressions
    cg = channel // num_groups          # input channels per group (conv1)
    mg = mid // num_groups              # output channels per group (conv1)
    k1, k2 = jax.random.split(key)
    # kernel_size=1 -> receptive field 1; fan_out = out_channels
    std1 = (2.0 / mid) ** 0.5
    std2 = (2.0 / channel) ** 0.5
    w1g = jax.random.normal(k1, (num_groups, mg, cg), jnp.float32) * std1
    w2g = jax.random.normal(k2, (num_groups, cg, mg), jnp.float32) * std2
    b1 = jnp.zeros((mid, 1), jnp.float32)     # nn.init.constant_(bias, 0.0)
    b2 = jnp.zeros((channel, 1), jnp.float32)
    return w1g, b1, w2g, b2


def ref_forward(x, w1g, b1, w2g, b2, num_groups):
    """Plain-JAX reference of the grouped-conv forward (for verification)."""
    N, C, D, H, W = x.shape
    S = D * H * W
    G = num_groups
    xs = x.astype(jnp.float32).reshape(N, C, S).reshape(N, G, C // G, S)
    h = jnp.einsum('goc,ngcs->ngos', w1g, xs) + b1.reshape(1, G, -1, 1)
    h = jnp.maximum(h, 0.0)
    y = jnp.einsum('gco,ngos->ngcs', w2g, h) + b2.reshape(1, G, -1, 1)
    y = jax.nn.sigmoid(y)
    return y.reshape(N, C, D, H, W)


if __name__ == "__main__":
    # Small shapes consistent with the module: channel divisible by groups and
    # by compressions*groups.
    N, C, D, H, W = 2, 64, 4, 8, 8
    num_groups, compressions = 8, 2

    key = jax.random.PRNGKey(0)
    kx, kf, kp = jax.random.split(key, 3)
    x = jax.random.normal(kx, (N, C, D, H, W), jnp.float32)

    w1g, b1, w2g, b2 = make_params(kp, C, num_groups, compressions)
    w1_bd = block_diag_from_groups(w1g)   # (C//compressions, C)
    w2_bd = block_diag_from_groups(w2g)   # (C, C//compressions)

    ref = ref_forward(x, w1g, b1, w2g, b2, num_groups)

    # 1) default fast path: f32 I/O, bf16 MXU feed (f32 accumulation)
    out = jax.block_until_ready(modulate_forward(x, w1_bd, b1, w2_bd, b2))
    assert out.shape == x.shape and out.dtype == x.dtype
    assert jnp.max(jnp.abs(out - ref)) < 2e-2

    # 2) exact-precision path (f32 MXU) matches module semantics tightly
    out_f32 = jax.block_until_ready(
        modulate_forward(x, w1_bd, b1, w2_bd, b2, mxu_dtype=jnp.float32))
    assert jnp.max(jnp.abs(out_f32 - ref)) < 1e-5

    # 3) spatial size not a multiple of 128 -> ragged last tile, no wrapper
    #    pad/slice HBM passes
    x_odd = jax.random.normal(kf, (1, C, 3, 7, 5), jnp.float32)
    ref_odd = ref_forward(x_odd, w1g, b1, w2g, b2, num_groups)
    out_odd = jax.block_until_ready(
        modulate_forward(x_odd, w1_bd, b1, w2_bd, b2, mxu_dtype=jnp.float32))
    assert out_odd.shape == x_odd.shape
    assert jnp.max(jnp.abs(out_odd - ref_odd)) < 1e-5

    # 4) bf16 I/O + bf16 gate output (halves HBM traffic on this mem-bound op)
    out_bf = jax.block_until_ready(
        modulate_forward(x.astype(jnp.bfloat16), w1_bd, b1, w2_bd, b2,
                         out_dtype=jnp.bfloat16))
    assert out_bf.dtype == jnp.bfloat16
    assert jnp.max(jnp.abs(out_bf.astype(jnp.float32) - ref)) < 2e-2

    # 5) fused gate * features output (saves a full HBM pass in the consumer)
    feat = jax.random.normal(kf, (N, C, D, H, W), jnp.float32)
    out_g = jax.block_until_ready(
        modulate_forward(x, w1_bd, b1, w2_bd, b2, features=feat))
    assert jnp.max(jnp.abs(out_g - ref * feat)) < 2e-2

    print("KERNEL_OK")
</pallas_src>

<mosaic_0001>
module attributes {stable_mosaic.version = 11 : i64} {
  func.func @modulate_kernel(%arg0: i32, %arg1: i32, %arg2: memref<1x64x256xf32, #tpu.memory_space<vmem>>, %arg3: memref<32x64xbf16, #tpu.memory_space<vmem>>, %arg4: memref<32x1xf32, #tpu.memory_space<vmem>>, %arg5: memref<64x32xbf16, #tpu.memory_space<vmem>>, %arg6: memref<64x1xf32, #tpu.memory_space<vmem>>, %arg7: memref<1x64x256xf32, #tpu.memory_space<vmem>>) attributes {dimension_semantics = [#tpu.dimension_semantics<parallel>, #tpu.dimension_semantics<parallel>], iteration_bounds = array<i64: 2, 1>, scalar_prefetch = 0 : i64, scratch_operands = 0 : i64, tpu.core_type = #tpu.core_type<tc>, window_params = [{transform_indices = @transform_0, window_bounds = array<i64: 1, 64, 256>}, {pipeline_mode = #tpu.pipeline_mode<synchronous>, transform_indices = @transform_1, window_bounds = array<i64: 32, 64>}, {pipeline_mode = #tpu.pipeline_mode<synchronous>, transform_indices = @transform_2, window_bounds = array<i64: 32, 1>}, {pipeline_mode = #tpu.pipeline_mode<synchronous>, transform_indices = @transform_3, window_bounds = array<i64: 64, 32>}, {pipeline_mode = #tpu.pipeline_mode<synchronous>, transform_indices = @transform_4, window_bounds = array<i64: 64, 1>}, {transform_indices = @transform_5, window_bounds = array<i64: 1, 64, 256>}]} {
    %c0 = arith.constant 0 : index
    %c0_0 = arith.constant 0 : index
    %0 = vector.load %arg3[%c0, %c0_0] : memref<32x64xbf16, #tpu.memory_space<vmem>>, vector<32x64xbf16>
    %c0_1 = arith.constant 0 : index
    %c0_2 = arith.constant 0 : index
    %1 = vector.load %arg5[%c0_1, %c0_2] : memref<64x32xbf16, #tpu.memory_space<vmem>>, vector<64x32xbf16>
    %c0_3 = arith.constant 0 : index
    %c0_4 = arith.constant 0 : index
    %c0_5 = arith.constant 0 : index
    %2 = vector.load %arg2[%c0_3, %c0_4, %c0_5] : memref<1x64x256xf32, #tpu.memory_space<vmem>>, vector<1x64x256xf32>
    %3 = vector.shape_cast %2 : vector<1x64x256xf32> to vector<64x256xf32>
    %4 = arith.truncf %3 : vector<64x256xf32> to vector<64x256xbf16>
    %cst = arith.constant dense<0.000000e+00> : vector<32x256xf32>
    %5 = tpu.matmul %0, %4, %cst {dimension_numbers = #tpu.dot_dimension_numbers<[1], [0], [0], [1], [0, 0, 1, 1], [], []>} : vector<32x64xbf16>, vector<64x256xbf16>, vector<32x256xf32> -> vector<32x256xf32>
    %c0_6 = arith.constant 0 : index
    %c0_7 = arith.constant 0 : index
    %6 = vector.load %arg4[%c0_6, %c0_7] : memref<32x1xf32, #tpu.memory_space<vmem>>, vector<32x1xf32>
    %7 = vector.broadcast %6 : vector<32x1xf32> to vector<32x256xf32>
    %8 = arith.addf %5, %7 : vector<32x256xf32>
    %cst_8 = arith.constant 0.000000e+00 : f32
    %9 = vector.broadcast %cst_8 : f32 to vector<32x256xf32>
    %10 = arith.maximumf %8, %9 : vector<32x256xf32>
    %11 = arith.truncf %10 : vector<32x256xf32> to vector<32x256xbf16>
    %cst_9 = arith.constant dense<0.000000e+00> : vector<64x256xf32>
    %12 = tpu.matmul %1, %11, %cst_9 {dimension_numbers = #tpu.dot_dimension_numbers<[1], [0], [0], [1], [0, 0, 1, 1], [], []>} : vector<64x32xbf16>, vector<32x256xbf16>, vector<64x256xf32> -> vector<64x256xf32>
    %c0_10 = arith.constant 0 : index
    %c0_11 = arith.constant 0 : index
    %13 = vector.load %arg6[%c0_10, %c0_11] : memref<64x1xf32, #tpu.memory_space<vmem>>, vector<64x1xf32>
    %14 = vector.broadcast %13 : vector<64x1xf32> to vector<64x256xf32>
    %15 = arith.addf %12, %14 : vector<64x256xf32>
    %cst_12 = arith.constant 5.000000e-01 : f32
    %16 = vector.broadcast %cst_12 : f32 to vector<64x256xf32>
    %17 = arith.mulf %16, %15 : vector<64x256xf32>
    %18 = math.tanh %17 : vector<64x256xf32>
    %cst_13 = arith.constant 5.000000e-01 : f32
    %19 = vector.broadcast %cst_13 : f32 to vector<64x256xf32>
    %20 = arith.mulf %19, %18 : vector<64x256xf32>
    %cst_14 = arith.constant 5.000000e-01 : f32
    %21 = vector.broadcast %cst_14 : f32 to vector<64x256xf32>
    %22 = arith.addf %20, %21 : vector<64x256xf32>
    %c0_15 = arith.constant 0 : index
    %c0_16 = arith.constant 0 : index
    %c0_17 = arith.constant 0 : index
    %23 = vector.load %arg7[%c0_15, %c0_16, %c0_17] : memref<1x64x256xf32, #tpu.memory_space<vmem>>, vector<1x64x256xf32>
    %24 = vector.shape_cast %23 : vector<1x64x256xf32> to vector<64x256xf32>
    %25 = vector.shape_cast %22 : vector<64x256xf32> to vector<1x64x256xf32>
    tpu.vector_store %arg7[%c0_15, %c0_16, %c0_17], %25 {strides = array<i32>} : memref<1x64x256xf32, #tpu.memory_space<vmem>>, vector<1x64x256xf32>,
    return
  }
  func.func @transform_0(%arg0: i32, %arg1: i32) -> (i32, i32, i32) {
    %c0_i32 = arith.constant 0 : i32
    %c0_i32_0 = arith.constant 0 : i32
    return %arg0, %c0_i32, %arg1 : i32, i32, i32
  }
  func.func @transform_1(%arg0: i32, %arg1: i32) -> (i32, i32) {
    %c0_i32 = arith.constant 0 : i32
    %c0_i32_0 = arith.constant 0 : i32
    %c0_i32_1 = arith.constant 0 : i32
    return %c0_i32, %c0_i32_0 : i32, i32
  }
  func.func @transform_2(%arg0: i32, %arg1: i32) -> (i32, i32) {
    %c0_i32 = arith.constant 0 : i32
    %c0_i32_0 = arith.constant 0 : i32
    %c0_i32_1 = arith.constant 0 : i32
    return %c0_i32, %c0_i32_0 : i32, i32
  }
  func.func @transform_3(%arg0: i32, %arg1: i32) -> (i32, i32) {
    %c0_i32 = arith.constant 0 : i32
    %c0_i32_0 = arith.constant 0 : i32
    %c0_i32_1 = arith.constant 0 : i32
    return %c0_i32, %c0_i32_0 : i32, i32
  }
  func.func @transform_4(%arg0: i32, %arg1: i32) -> (i32, i32) {
    %c0_i32 = arith.constant 0 : i32
    %c0_i32_0 = arith.constant 0 : i32
    %c0_i32_1 = arith.constant 0 : i32
    return %c0_i32, %c0_i32_0 : i32, i32
  }
  func.func @transform_5(%arg0: i32, %arg1: i32) -> (i32, i32, i32) {
    %c0_i32 = arith.constant 0 : i32
    %c0_i32_0 = arith.constant 0 : i32
    return %arg0, %c0_i32, %arg1 : i32, i32, i32
  }
}

</mosaic_0001>

<bundles_post_ra>
// kernel: tpu_custom_call.1
= control target key start
LH: loop header
LB: loop body
LE: loop exit
PB: predicated region body
PF: predicated region fallthrough
CT: control target
= control target key end

     0   :  { %10 = vsyncpa [#allocation3], 0  ;;  %s1277_s0 = inlined_call_operand.hbm [shape: f32[2,64,256], index: 0, kind: input, shape index: {}]   ;;  %s1278_s1 = inlined_call_operand.vmem [shape: bf16[32,64], index: 1, kind: input, shape index: {}]   ;;  %s1279_s2 = inlined_call_operand.vmem [shape: f32[32,1], index: 2, kind: input, shape index: {}]   ;;  %s1280_s3 = inlined_call_operand.vmem [shape: bf16[64,32], index: 3, kind: input, shape index: {}]   ;;  %s1281_s4 = inlined_call_operand.vmem [shape: f32[64,1], index: 4, kind: input, shape index: {}]   ;;  %s1282_s5 = inlined_call_operand.hbm [shape: f32[2,64,256], index: 5, kind: output, shape index: {}]  }
   0x1   :  { %12 = vsyncpa [#allocation3 + $0x1], 0 }
   0x2   :  { %13 = vsyncpa [#allocation4], 0 }
   0x3   :  { %15 = vsyncpa [#allocation4 + $0x1], 0  ;;  %s1026_s18 = smov 0   ;;  %s1028_s19 = smov 0  }
   0x4   :  { %s1030_s20 = smov 0   ;;  %s1032_s21 = smov 0  }
   0x5   :  { %s1034_s22 = smov 0   ;;  %s1036_s23 = smov 0  }
   0x6 LB: > { %s743_s24 = sadd.s32 4294967295, %s987_s23   ;;  %s744_s25 = sadd.s32 4294967294, %s987_s23   ;;  %s987_s23 = sphi %s1036_s23, %s21_s23   ;;  %s983_s22 = sphi %s1034_s22, %s1293_s22   ;;  %s979_s21 = sphi %s1032_s21, %s1292_s21   ;;  %s975_s20 = sphi %s1030_s20, %s1291_s20   ;;  %s971_s19 = sphi %s1028_s19, %s1290_s19   ;;  %s967_s18 = sphi %s1026_s18, %s1289_s18  }
   0x7   : > { %s33_s26 = sadd.s32 1, %s983_s22  ;;  %s42_s27 = sadd.s32 1, %s975_s20 }
   0x8   : > { %p35_p0 = scmp.ge.s32.totalorder %s33_s26, 2  ;;  %p49_p1 = scmp.ne.s32.totalorder %s975_s20, %s971_s19 }
   0x9   : > { %p50_p2 = scmp.eq.s32.totalorder %s987_s23, 0  ;;  %p55_p3 = scmp.ne.s32.totalorder %s971_s19, %s967_s18 }
   0xa   : > { %s1295_s26 = smov (%p35_p0, %s33_s26), 0  ;;  %p56_p5 = scmp.eq.s32.totalorder %s743_s24, 0 }
   0xb   : > { %p1067_p4 = por %p50_p2, %p49_p1  ;;  %s37_s29 = ssub.s32 %s983_s22, %s1295_s26 }
   0xc   : > { %p165_p6 = scmp.eq.s32.totalorder %s743_s24, 1  ;;  %p40_p7 = scmp.eq.s32.totalorder %s37_s29, 0 }
   0xd   : > { %p1073_p8 = por %p56_p5, %p55_p3  ;;  %p171_p10 = scmp.eq.s32.totalorder %s744_s25, 1 }
   0xe   : > { %p1077_p9 = por %p165_p6, %p49_p1  ;;  %p784_p13 = scmp.lt.s32.totalorder %s987_s23, 2 }
   0xf   : > { %s1082_s7 = scalar_select %p40_p7, %s975_s20, %s42_s27  }
  0x10   : > { %p1084_p11 = por %p171_p10, %p55_p3  ;;  %s203_s9 = sand.u32 1, %s975_s20  }
  0x11   : > { %s747_s10 = sshll.u32 %s203_s9, 7  ;;  %s770_s11 = sshll.u32 %s983_s22, 11 }
  0x12   : > { %s215_s14 = scalar_lea.hbm %s1277_s0, %s770_s11  ;;  %s207_s15 = scalar_lea.vmem [#allocation2], %s747_s10 }
  0x13   : > { %s216_s16 = sshll.u32 %s207_s15, 4  ;;  %p1097_p0 = pnand %p784_p13, %p1067_p4  ;;  %s217_s16 = int_to_ptr.vmem [resolvable:$true] %s216_s16 }
  0x14   : > { %p750_p1 = scmp.ge.s32.totalorder %s987_s23, 1  ;;  %s204_s24 = scalar_lea.sflag [#allocation3], %s203_s9 }
  0x15   : > { %p881_p2 = pneg %p1097_p0  ;;  %s892_s25 = scalar_lea.vmem %s217_s16, 2048 }
  0x16   : > { %p893_p3 = scmp.ne.s32.totalorder %s217_s16, %s892_s25  ;;  %s989_s27 = smov [#allocation2]  }
  0x17   : > { %s897_s29 = sshll.u32 %s989_s27, 4  ;;  %s898_s29 = int_to_ptr.vmem [resolvable:$false] %s897_s29 }
  0x18   : > { %p895_p5 = pnand %p893_p3, %p881_p2  ;;  %s899_s10 = scalar_lea.vmem %s898_s29, 4096 }
  0x19   : > { %p900_p7 = scmp.lt.s32.totalorder %s217_s16, %s898_s29  ;;  %p901_p10 = scmp.lt.s32.totalorder %s899_s10, %s892_s25 }
  0x1a   : > { %p896_p6 = pneg %p895_p5 }
  0x1b   : > { %p902_p12 = por %p901_p10, %p900_p7 }
  0x1d   : > { %p903_p4 = pnand %p902_p12, %p896_p6 }
  0x1f   : > { %906 = shalt.err (!%p903_p4)
}
  0x20   : > { %s990_s28 = smov 256   ;;  %s991_s9 = smov 16  }
  0x21   : > { %779 = dma.hbm_to_vmem [thread:$0]  (!%p1097_p0), %s215_s14, 2048, %s217_s16, %s204_s24, %s990_s28, %s990_s28, %s991_s9  }
  0x22   : > { %p224_p13 = scmp.lt.s32.totalorder %s987_s23, 3 }
  0x24   : > { %p225_p2 = pnand %p750_p1, %p224_p13 }
  0x25   : > { %s1110_s11 = sand.u32 (!%p225_p2), 1, %s971_s19  }
  0x26   : > { %228 = sbr.rel (%p225_p2) target bundleno = 543 (0x21f), region = 40  ;;  %s751_s12 = sshll.u32 (!%p225_p2), %s1110_s11, 7 }
  0x27   : > { %s231_s13 = scalar_lea.sflag (!%p225_p2), [#allocation3], %s1110_s11  ;;  %s1116_s15 = scalar_lea.vmem (!%p225_p2), [#allocation2], %s751_s12 }
  0x2b   : > { %958 = dma.done.wait (%p1073_p8), %s231_s13, 2048  }
  0x2c   : > { %960 = vsyncadd (%p1073_p8), %s231_s13, 4294965248  ;;  %v992_v0 = vmov 0   ;;  %v289_v1 = vld [vmem:[%s1116_s15 + $0x68] sm:$0xff]  ;;  %v291_v2 = vld [vmem:[%s1116_s15 + $0x78] sm:$0xff]  ;;  %vm334_vm0 = vcmask 523264   ;;  %vm474_vm1 = vcmask 261120  }
  0x2d   : > { %373 = vmatprep.mubr.bf16.mxu0 %v992_v0  ;;  %839 = vset.pattern.permute.xlu0 %v992_v0  ;;  %v288_v3 = vld [vmem:[%s1116_s15 + $0x60] sm:$0xff]  ;;  %v299_v4 = vpack.c.bf16 %v291_v2, %v289_v1  ;;  %v290_v5 = vld [vmem:[%s1116_s15 + $0x70] sm:$0xff]  ;;  %v285_v6 = vld [vmem:[%s1116_s15 + $0x48] sm:$0xff]  ;;  %s1204_s9 = scalar_lea.vmem [#allocation5], %s751_s12  ;;  %s771_s12 = sshll.u32 %s979_s21, 11 }
  0x2e   : > { %840 = vset.pattern.permute.xlu1 %v992_v0  ;;  %519 = vmatprep.mubr.bf16.mxu1 %v992_v0  ;;  %v287_v7 = vld [vmem:[%s1116_s15 + $0x58] sm:$0xff]  ;;  %v298_v8 = vpack.c.bf16 %v290_v5, %v288_v3  ;;  %v284_v10 = vld [vmem:[%s1116_s15 + $0x40] sm:$0xff]  ;;  %v286_v11 = vld [vmem:[%s1116_s15 + $0x50] sm:$0xff]  ;;  %s656_s13 = sshll.u32 %s1204_s9, 4  ;;  %s1225_s14 = scalar_lea.hbm %s1282_s5, %s771_s12  ;;  %s1227_s13 = int_to_ptr.vmem [resolvable:$true] %s656_s13 }
  0x2f   : > { %v297_v9 = vpack.c.bf16 %v287_v7, %v285_v6  ;;  %v281_v12 = vld [vmem:[%s1116_s15 + $0x28] sm:$0xff]  ;;  %349 = vmatprep.subr.bf16.mxu0 %v299_v4  ;;  %v283_v13 = vld [vmem:[%s1116_s15 + $0x38] sm:$0xff]  ;;  %v296_v14 = vpack.c.bf16 %v286_v11, %v284_v10  ;;  %v280_v15 = vld [vmem:[%s1116_s15 + $0x20] sm:$0xff]  ;;  %s641_s21 = scalar_lea.sflag [#allocation4], %s1110_s11  ;;  %s907_s16 = scalar_lea.vmem %s1227_s13, 2048 }
  0x30   : > { %350 = vmatpush1.bf16.msra.mxu0 %v298_v8  ;;  %v282_v16 = vld [vmem:[%s1116_s15 + $0x30] sm:$0xff]  ;;  %v295_v17 = vpack.c.bf16 %v283_v13, %v281_v12  ;;  %v277_v18 = vld [vmem:[%s1116_s15 + $0x8] sm:$0xff]  ;;  %v279_v19 = vld [vmem:[%s1116_s15 + $0x18] sm:$0xff]  ;;  %p908_p8 = scmp.ne.s32.totalorder %s1227_s13, %s907_s16  ;;  %s993_s17 = smov [#allocation5]  }
  0x31   : > { %351 = vmatprep.subr.bf16.mxu0 %v297_v9  ;;  %v302_v20 = vld [vmem:[%s1279_s2 + $0x10] sm:$0xff]  ;;  %v294_v21 = vpack.c.bf16 %v282_v16, %v280_v15  ;;  %v300_v22 = vld [vmem:[%s1279_s2] sm:$0xff]  ;;  %v293_v23 = vpack.c.bf16 %v279_v19, %v277_v18  ;;  %v303_v26 = vld [vmem:[%s1279_s2 + $0x18] sm:$0xff]  ;;  %s911_s24 = sshll.u32 %s993_s17, 4  ;;  %s912_s24 = int_to_ptr.vmem [resolvable:$false] %s911_s24 }
  0x32   : > { %316 = vperm.xlu0 %839, %v302_v20   ;;  %v276_v24 = vld [vmem:[%s1116_s15] sm:$0xff]  ;;  %v278_v25 = vld [vmem:[%s1116_s15 + $0x10] sm:$0xff]  ;;  %306 = vperm.xlu1 %840, %v300_v22   ;;  %v301_v27 = vld [vmem:[%s1279_s2 + $0x8] sm:$0xff]  ;;  %p909_p12 = pnand %p908_p8, %p1077_p9  ;;  %s913_s25 = scalar_lea.vmem %s912_s24, 4096 }
  0x33   : > { %v406_v28 = vld [vmem:[%s1281_s4] sm:$0xff]  ;;  %v292_v29 = vpack.c.bf16 %v278_v25, %v276_v24  ;;  %v407_v30 = vld [vmem:[%s1281_s4 + $0x8] sm:$0xff]  ;;  %v408_v32 = vld [vmem:[%s1281_s4 + $0x10] sm:$0xff]  ;;  %p914_p1 = scmp.lt.s32.totalorder %s1227_s13, %s912_s24  ;;  %p915_p3 = scmp.lt.s32.totalorder %s913_s25, %s907_s16 }
  0x34   : > { %352 = vmatpush1.bf16.msra.mxu0 %v296_v14  ;;  %v841_v31 = vld [vmem:[%s1278_s1] sm:$0xff]   ;;  %v409_v33 = vld [vmem:[%s1281_s4 + $0x18] sm:$0xff]  ;;  %v411_v35 = vld [vmem:[%s1281_s4 + $0x28] sm:$0xff]  ;;  %p910_p0 = pneg %p909_p12 }
  0x35   : > { %353 = vmatprep.subr.bf16.mxu0 %v295_v17  ;;  %v410_v34 = vld [vmem:[%s1281_s4 + $0x20] sm:$0xff]  ;;  %v842_v36 = vld [vmem:[%s1278_s1 + $0x8] sm:$0xff]   ;;  %v412_v37 = vld [vmem:[%s1281_s4 + $0x30] sm:$0xff]  ;;  %p916_p5 = por %p915_p3, %p914_p1 }
  0x36   : > { %321 = vperm.xlu0 %839, %v303_v26   ;;  %311 = vperm.xlu1 %840, %v301_v27   ;;  %v413_v38 = vld [vmem:[%s1281_s4 + $0x38] sm:$0xff]  ;;  %v843_v8 = vld [vmem:[%s1280_s3] sm:$0xff]   ;;  %v844_v9 = vld [vmem:[%s1280_s3 + $0x8] sm:$0xff]  }
  0x37   : > { %v845_v10 = vld [vmem:[%s1280_s3 + $0x10] sm:$0xff]   ;;  %v846_v11 = vld [vmem:[%s1280_s3 + $0x18] sm:$0xff]   ;;  %p917_p6 = pnand %p916_p5, %p910_p0 }
  0x38   : > { %354 = vmatpush1.bf16.msra.mxu0 %v294_v21 }
  0x39   : > { %355 = vmatprep.subr.bf16.mxu0 %v293_v23 }
  0x3a   : > { %416 = vperm.xlu0 %839, %v406_v28   ;;  %421 = vperm.xlu1 %840, %v407_v30  }
  0x3c   : > { %356 = vmatpush1.bf16.msra.mxu0 %v292_v29 }
  0x3e   : > { %426 = vperm.xlu0 %839, %v408_v32   ;;  %431 = vperm.xlu1 %840, %v409_v33  }
  0x3f   : > { %755 = vmatmul.mubr.msk.bf16.vlgmr.msra.gmra.mxu0 %vm334_vm0, %v841_v31 }
  0x40   : > { %383 = vmatprep.mubr.bf16.mxu0 %v992_v0 }
  0x42   : > { %436 = vperm.xlu0 %839, %v410_v34   ;;  %441 = vperm.xlu1 %840, %v411_v35  }
  0x46   : > { %446 = vperm.xlu0 %839, %v412_v37   ;;  %451 = vperm.xlu1 %840, %v413_v38  }
  0x47   : > { %756 = vmatmul.mubr.msk.bf16.gmra.mxu0 %vm334_vm0, %v842_v36 }
  0xad   : > { %v317_v42 = vpop.permute.xlu0 %316  ;;  %v307_v43 = vpop.permute.xlu1 %306 }
  0xb1   : > { %v322_v47 = vpop.permute.xlu0 %321  ;;  %v312_v48 = vpop.permute.xlu1 %311 }
  0xb5   : > { %v417_v12 = vpop.permute.xlu0 %416  ;;  %v422_v18 = vpop.permute.xlu1 %421 }
  0xb9   : > { %v427_v24 = vpop.permute.xlu0 %426  ;;  %v432_v31 = vpop.permute.xlu1 %431 }
  0xbd   : > { %v437_v38 = vpop.permute.xlu0 %436 }
  0xff   : > { %v375_v39 = vpop.f32.mrf.mxu0 }
 0x100   : > { %v376_v62 = vadd.f32 %v375_v39, %v307_v43 }
 0x101   : > { %v377_v40 = vpop.f32.mrf.mxu0 }
 0x102   : > { %v378_v55 = vadd.f32 %v377_v40, %v307_v43  ;;  %v394_v6 = vmax.f32 %v376_v62, 0.0 }
 0x103   : > { %v379_v41 = vpop.f32.mrf.mxu0 }
 0x104   : > { %v380_v57 = vadd.f32 %v379_v41, %v312_v48  ;;  %v395_v1 = vmax.f32 %v378_v55, 0.0 }
 0x105   : > { %v381_v44 = vpop.f32.mrf.mxu0 }
 0x106   : > { %v382_v50 = vadd.f32 %v381_v44, %v312_v48  ;;  %v396_v3 = vmax.f32 %v380_v57, 0.0 }
 0x107   : > { %v385_v45 = vpop.f32.mrf.mxu0 }
 0x108   : > { %v386_v53 = vadd.f32 %v385_v45, %v317_v42  ;;  %v397_v59 = vmax.f32 %v382_v50, 0.0  ;;  %v402_v7 = vpack.c.bf16 %v396_v3, %v394_v6 }
 0x109   : > { %v387_v46 = vpop.f32.mrf.mxu0 }
 0x10a   : > { %v388_v51 = vadd.f32 %v387_v46, %v317_v42  ;;  %v398_v63 = vmax.f32 %v386_v53, 0.0  ;;  %v403_v5 = vpack.c.bf16 %v397_v59, %v395_v1 }
 0x10b   : > { %v389_v49 = vpop.f32.mrf.mxu0 }
 0x10c   : > { %v390_v52 = vadd.f32 %v389_v49, %v322_v47  ;;  %v399_v60 = vmax.f32 %v388_v51, 0.0  ;;  %v442_v49 = vpop.permute.xlu1 %441 }
 0x10d   : > { %v391_v54 = vpop.f32.mrf.mxu0 }
 0x10e   : > { %v392_v56 = vadd.f32 %v391_v54, %v322_v47  ;;  %v400_v58 = vmax.f32 %v390_v52, 0.0 }
 0x110   : > { %v401_v61 = vmax.f32 %v392_v56, 0.0  ;;  %v404_v4 = vpack.c.bf16 %v400_v58, %v398_v63 }
 0x112   : > { %v405_v2 = vpack.c.bf16 %v401_v61, %v399_v60  ;;  %v447_v60 = vpop.permute.xlu0 %446 }
 0x114   : > { %499 = vmatprep.subr.bf16.mxu1 %v405_v2 }
 0x115   : > { %500 = vmatpush1.bf16.msra.mxu1 %v404_v4 }
 0x116   : > { %501 = vmatprep.subr.bf16.mxu1 %v403_v5 }
 0x119   : > { %502 = vmatpush1.bf16.msra.mxu1 %v402_v7 }
 0x11c   : > { %761 = vmatmul.mubr.msk.bf16.vlgmr.msra.gmra.mxu1 %vm474_vm1, %v843_v8 }
 0x11d   : > { %529 = vmatprep.mubr.bf16.mxu1 %v992_v0 }
 0x124   : > { %762 = vmatmul.mubr.msk.bf16.gmra.mxu1 %vm474_vm1, %v844_v9 }
 0x125   : > { %539 = vmatprep.mubr.bf16.mxu1 %v992_v0 }
 0x12c   : > { %763 = vmatmul.mubr.msk.bf16.gmra.mxu1 %vm474_vm1, %v845_v10  ;;  %v452_v10 = vpop.permute.xlu1 %451 }
 0x12d   : > { %549 = vmatprep.mubr.bf16.mxu1 %v992_v0 }
 0x134   : > { %764 = vmatmul.mubr.msk.bf16.gmra.mxu1 %vm474_vm1, %v846_v11 }
 0x1dc   : > { %v521_v13 = vpop.f32.mrf.mxu1 }
 0x1dd   : > { %v522_v14 = vadd.f32 %v521_v13, %v417_v12 }
 0x1de   : > { %v523_v15 = vpop.f32.mrf.mxu1 }
 0x1df   : > { %v560_v16 = vmul.f32 0.5, %v522_v14  ;;  %v524_v17 = vadd.f32 %v523_v15, %v417_v12 }
 0x1e0   : > { %v525_v19 = vpop.f32.mrf.mxu1 }
 0x1e1   : > { %847 = vtanh.f32 %v560_v16  ;;  %v561_v20 = vmul.f32 0.5, %v524_v17  ;;  %v526_v21 = vadd.f32 %v525_v19, %v422_v18 }
 0x1e2   : > { %v527_v22 = vpop.f32.mrf.mxu1 }
 0x1e3   : > { %849 = vtanh.f32 %v561_v20  ;;  %v562_v23 = vmul.f32 0.5, %v526_v21  ;;  %v528_v0 = vadd.f32 %v527_v22, %v422_v18 }
 0x1e4   : > { %v531_v25 = vpop.f32.mrf.mxu1 }
 0x1e5   : > { %851 = vtanh.f32 %v562_v23  ;;  %v563_v26 = vmul.f32 0.5, %v528_v0  ;;  %v532_v27 = vadd.f32 %v531_v25, %v427_v24 }
 0x1e6   : > { %v533_v28 = vpop.f32.mrf.mxu1 }
 0x1e7   : > { %853 = vtanh.f32 %v563_v26  ;;  %v564_v29 = vmul.f32 0.5, %v532_v27  ;;  %v534_v30 = vadd.f32 %v533_v28, %v427_v24 }
 0x1e8   : > { %v535_v32 = vpop.f32.mrf.mxu1 }
 0x1e9   : > { %855 = vtanh.f32 %v564_v29  ;;  %v565_v33 = vmul.f32 0.5, %v534_v30  ;;  %v536_v34 = vadd.f32 %v535_v32, %v432_v31 }
 0x1ea   : > { %v537_v35 = vpop.f32.mrf.mxu1 }
 0x1eb   : > { %857 = vtanh.f32 %v565_v33  ;;  %v566_v36 = vmul.f32 0.5, %v536_v34  ;;  %v538_v37 = vadd.f32 %v537_v35, %v432_v31 }
 0x1ec   : > { %v541_v39 = vpop.f32.mrf.mxu1 }
 0x1ed   : > { %859 = vtanh.f32 %v566_v36  ;;  %v567_v40 = vmul.f32 0.5, %v538_v37  ;;  %v542_v41 = vadd.f32 %v541_v39, %v437_v38 }
 0x1ee   : > { %v848_v42 = vpop.eup %847  ;;  %v543_v43 = vpop.f32.mrf.mxu1 }
 0x1ef   : > { %v592_v44 = vmul.f32 0.5, %v848_v42  ;;  %861 = vtanh.f32 %v567_v40  ;;  %v568_v45 = vmul.f32 0.5, %v542_v41  ;;  %v544_v46 = vadd.f32 %v543_v43, %v437_v38 }
 0x1f0   : > { %v850_v47 = vpop.eup %849  ;;  %v545_v48 = vpop.f32.mrf.mxu1 }
 0x1f1   : > { %v608_v50 = vadd.f32 0.5, %v592_v44  ;;  %v593_v51 = vmul.f32 0.5, %v850_v47  ;;  %863 = vtanh.f32 %v568_v45  ;;  %v569_v52 = vmul.f32 0.5, %v544_v46 }
 0x1f2   : > { %v852_v53 = vpop.eup %851  ;;  %v546_v54 = vadd.f32 %v545_v48, %v442_v49  ;;  %v547_v55 = vpop.f32.mrf.mxu1 }
 0x1f3   : > { %624 = vst [vmem:[%s1204_s9] sm:$0xff] %v608_v50  ;;  %v609_v56 = vadd.f32 0.5, %v593_v51  ;;  %v594_v57 = vmul.f32 0.5, %v852_v53  ;;  %865 = vtanh.f32 %v569_v52  ;;  %v548_v58 = vadd.f32 %v547_v55, %v442_v49 }
 0x1f4   : > { %v854_v59 = vpop.eup %853  ;;  %v570_v61 = vmul.f32 0.5, %v546_v54  ;;  %v551_v62 = vpop.f32.mrf.mxu1 }
 0x1f5   : > { %625 = vst [vmem:[%s1204_s9 + $0x8] sm:$0xff] %v609_v56  ;;  %v610_v63 = vadd.f32 0.5, %v594_v57  ;;  %v595_v1 = vmul.f32 0.5, %v854_v59  ;;  %v571_v2 = vmul.f32 0.5, %v548_v58  ;;  %v552_v3 = vadd.f32 %v551_v62, %v447_v60 }
 0x1f6   : > { %v856_v4 = vpop.eup %855  ;;  %867 = vtanh.f32 %v570_v61  ;;  %v553_v5 = vpop.f32.mrf.mxu1 }
 0x1f7   : > { %626 = vst [vmem:[%s1204_s9 + $0x10] sm:$0xff] %v610_v63  ;;  %v611_v6 = vadd.f32 0.5, %v595_v1  ;;  %v596_v7 = vmul.f32 0.5, %v856_v4  ;;  %869 = vtanh.f32 %v571_v2  ;;  %v572_v8 = vmul.f32 0.5, %v552_v3 }
 0x1f8   : > { %v858_v9 = vpop.eup %857  ;;  %v554_v11 = vadd.f32 %v553_v5, %v447_v60  ;;  %v555_v12 = vpop.f32.mrf.mxu1 }
 0x1f9   : > { %627 = vst [vmem:[%s1204_s9 + $0x18] sm:$0xff] %v611_v6  ;;  %v612_v13 = vadd.f32 0.5, %v596_v7  ;;  %v597_v14 = vmul.f32 0.5, %v858_v9  ;;  %871 = vtanh.f32 %v572_v8  ;;  %v556_v15 = vadd.f32 %v555_v12, %v452_v10 }
 0x1fa   : > { %v860_v16 = vpop.eup %859  ;;  %v573_v17 = vmul.f32 0.5, %v554_v11  ;;  %v557_v18 = vpop.f32.mrf.mxu1 }
 0x1fb   : > { %628 = vst [vmem:[%s1204_s9 + $0x20] sm:$0xff] %v612_v13  ;;  %v613_v19 = vadd.f32 0.5, %v597_v14  ;;  %v598_v20 = vmul.f32 0.5, %v860_v16  ;;  %v574_v21 = vmul.f32 0.5, %v556_v15  ;;  %v558_v22 = vadd.f32 %v557_v18, %v452_v10 }
 0x1fc   : > { %v862_v23 = vpop.eup %861  ;;  %873 = vtanh.f32 %v573_v17 }
 0x1fd   : > { %629 = vst [vmem:[%s1204_s9 + $0x28] sm:$0xff] %v613_v19  ;;  %v614_v0 = vadd.f32 0.5, %v598_v20  ;;  %v599_v24 = vmul.f32 0.5, %v862_v23  ;;  %875 = vtanh.f32 %v574_v21  ;;  %v575_v25 = vmul.f32 0.5, %v558_v22 }
 0x1fe   : > { %v864_v26 = vpop.eup %863 }
 0x1ff   : > { %630 = vst [vmem:[%s1204_s9 + $0x30] sm:$0xff] %v614_v0  ;;  %v615_v27 = vadd.f32 0.5, %v599_v24  ;;  %v600_v28 = vmul.f32 0.5, %v864_v26  ;;  %877 = vtanh.f32 %v575_v25 }
 0x200   : > { %v866_v29 = vpop.eup %865 }
 0x201   : > { %631 = vst [vmem:[%s1204_s9 + $0x38] sm:$0xff] %v615_v27  ;;  %v616_v30 = vadd.f32 0.5, %v600_v28  ;;  %v601_v31 = vmul.f32 0.5, %v866_v29 }
 0x203   : > { %v868_v32 = vpop.eup %867  ;;  %632 = vst [vmem:[%s1204_s9 + $0x40] sm:$0xff] %v616_v30  ;;  %v617_v33 = vadd.f32 0.5, %v601_v31 }
 0x204   : > { %v870_v34 = vpop.eup %869  ;;  %v602_v35 = vmul.f32 0.5, %v868_v32 }
 0x205   : > { %633 = vst [vmem:[%s1204_s9 + $0x48] sm:$0xff] %v617_v33  ;;  %v603_v36 = vmul.f32 0.5, %v870_v34 }
 0x206   : > { %v872_v37 = vpop.eup %871  ;;  %v618_v38 = vadd.f32 0.5, %v602_v35 }
 0x207   : > { %v619_v39 = vadd.f32 0.5, %v603_v36  ;;  %v604_v40 = vmul.f32 0.5, %v872_v37 }
 0x208   : > { %634 = vst [vmem:[%s1204_s9 + $0x50] sm:$0xff] %v618_v38 }
 0x209   : > { %v874_v41 = vpop.eup %873  ;;  %635 = vst [vmem:[%s1204_s9 + $0x58] sm:$0xff] %v619_v39  ;;  %v620_v42 = vadd.f32 0.5, %v604_v40 }
 0x20a   : > { %v876_v43 = vpop.eup %875  ;;  %v605_v44 = vmul.f32 0.5, %v874_v41 }
 0x20b   : > { %636 = vst [vmem:[%s1204_s9 + $0x60] sm:$0xff] %v620_v42  ;;  %v606_v45 = vmul.f32 0.5, %v876_v43 }
 0x20c   : > { %v878_v46 = vpop.eup %877  ;;  %v621_v47 = vadd.f32 0.5, %v605_v44 }
 0x20d   : > { %v622_v48 = vadd.f32 0.5, %v606_v45  ;;  %v607_v49 = vmul.f32 0.5, %v878_v46 }
 0x20e   : > { %637 = vst [vmem:[%s1204_s9 + $0x68] sm:$0xff] %v621_v47 }
 0x20f   : > { %638 = vst [vmem:[%s1204_s9 + $0x70] sm:$0xff] %v622_v48  ;;  %v623_v50 = vadd.f32 0.5, %v607_v49 }
 0x211   : > { %639 = vst [vmem:[%s1204_s9 + $0x78] sm:$0xff] %v623_v50 }
 0x212   : > { %920 = shalt.err (!%p917_p6)
}
 0x213   : > { %s921_s27 = scalar_lea.hbm %s1225_s14, 2048  ;;  %s925_s28 = scalar_lea.hbm %s1282_s5, 4096 }
 0x214   : > { %p922_p7 = scmp.ne.s32.totalorder %s1225_s14, %s921_s27  ;;  %p926_p13 = scmp.lt.s32.totalorder %s1225_s14, %s1282_s5 }
 0x215   : > { %p927_p2 = scmp.lt.s32.totalorder %s925_s28, %s921_s27 }
 0x216   : > { %p923_p10 = pnand %p922_p7, %p1077_p9 }
 0x217   : > { %p928_p8 = por %p927_p2, %p926_p13 }
 0x218   : > { %p924_p4 = pneg %p923_p10 }
 0x21a   : > { %p929_p12 = pnand %p928_p8, %p924_p4 }
 0x21c   : > { %932 = shalt.err (!%p929_p12)
}
 0x21d   : > { %s994_s15 = smov 256   ;;  %s995_s30 = smov 16  }
 0x21e   : > { %774 = dma.vmem_to_hbm [thread:$0]  (%p1077_p9), %s1227_s13, 2048, %s1225_s14, %s641_s21, %s994_s15, %s994_s15, %s995_s30  }
 0x21f PF: > { %s671_s16 = sand.u32 1, %s967_s18   ;;  %p1288_p0 = scmp.ge.s32.totalorder %s987_s23, 2 }
 0x220   : > { %s672_s17 = scalar_lea.sflag [#allocation4], %s671_s16 }
 0x221   : > { %p781_p1 = pnand %p1288_p0, %p1084_p11 }
 0x223   : > { %p782_p3 = pneg %p781_p1 }
 0x225   : > { %962 = dma.done.wait (%p782_p3), %s672_s17, 2048  }
 0x226   : > { %964 = vsyncadd (%p782_p3), %s672_s17, 4294965248  ;;  %s21_s23 = sadd.s32 1, %s987_s23   ;;  %s1289_s18 = smov %s971_s19 }
 0x227   : > { %p18_p5 = scmp.ge.s32.totalorder %s21_s23, 4   ;;  %s1290_s19 = smov %s975_s20 }
 0x228   : > { %s1291_s20 = smov %s1082_s7  ;;  %s1292_s21 = smov %s983_s22 }
 0x229   : > { %s1293_s22 = smov %s1295_s26  ;;  %20 = sbr.rel (!%p18_p5) target bundleno = 6 (0x6), region = 85 }
 0x22e   :  { %677 = vsyncpa [#allocation3], 1 }
 0x22f   :  { %679 = vsyncpa [#allocation3 + $0x1], 1 }
 0x230   :  { %680 = vsyncpa [#allocation4], 1 }
 0x231   :  { %682 = vsyncpa [#allocation4 + $0x1], 1 }

</bundles_post_ra>
